<compile_context>
chip_gen: v7x
topology: tpu7x:2x2x1
jax: 0.10.0
libtpu: 0.0.40
codegen_flags: <defaults>
</compile_context>

<pallas_src>
import jax
import jax.numpy as jnp
from jax import lax
from jax.experimental import pallas as pl
from jax.experimental.pallas import tpu as pltpu

_EPS = 1e-5


def bn_apply_kernel(x_ref, params_ref, o_ref):
    # params_ref: (2, C) f32 -- row 0 = scale, row 1 = shift.
    scale = params_ref[0:1, :]                      # (1, C), broadcasts over rows
    shift = params_ref[1:2, :]                      # (1, C)
    x = x_ref[...].astype(jnp.float32)              # keep math in f32
    o_ref[...] = (x * scale + shift).astype(o_ref.dtype)


def fold_bn_params(weight, bias, running_mean, running_var, eps=_EPS):
    """Init-time fold (call ONCE; eval mode => running stats are frozen).

    scale = weight * rsqrt(running_var + eps)
    shift = bias - running_mean * scale
    """
    w = weight.astype(jnp.float32)
    b = bias.astype(jnp.float32)
    m = running_mean.astype(jnp.float32)
    v = running_var.astype(jnp.float32)
    scale = w * lax.rsqrt(v + eps)
    shift = b - m * scale
    return jnp.stack([scale, shift], axis=0)        # (2, C) f32


def batchnorm1d_eval_apply(x, params):
    """Per-call hot path: x (N, C) + pre-folded params (2, C) -> y (N, C)."""
    n, c = x.shape
    return pl.pallas_call(
        bn_apply_kernel,
        out_shape=jax.ShapeDtypeStruct((n, c), x.dtype),
        # No grid: single invocation, full-array blocks resident in VMEM.
        in_specs=[
            pl.BlockSpec(memory_space=pltpu.MemorySpace.VMEM),   # x
            pl.BlockSpec(memory_space=pltpu.MemorySpace.VMEM),   # params (2, C)
        ],
        out_specs=pl.BlockSpec(memory_space=pltpu.MemorySpace.VMEM),
    )(x, params)


def batchnorm1d_eval(x, weight, bias, running_mean, running_var):
    """Full module forward (convenience composition for the test harness).

    In production the fold is hoisted to model init; it is kept out of the
    kernel and out of any per-step jitted loop.
    """
    params = fold_bn_params(weight, bias, running_mean, running_var)
    return batchnorm1d_eval_apply(x, params)


if __name__ == "__main__":
    # Shapes per the module annotation: x [2, 5]; params [5] each.
    weight = jnp.array([2.0, 3.0, 2.0, 1.5, 0.5], dtype=jnp.float32)
    bias = jnp.array([0.2, 0.4, 0.3, -0.1, 0.0], dtype=jnp.float32)
    running_mean = jnp.array([0.1, -0.2, 0.3, 0.0, 0.5], dtype=jnp.float32)
    running_var = jnp.array([1.0, 0.5, 2.0, 1.5, 0.8], dtype=jnp.float32)

    key = jax.random.PRNGKey(0)
    x = jax.random.normal(key, (2, 5), dtype=jnp.float32)

    # Init-time fold (once), then the 2-operand kernel.
    params = fold_bn_params(weight, bias, running_mean, running_var)
    out = batchnorm1d_eval_apply(x, params)
    out = jax.block_until_ready(out)

    # Pure-JAX reference: eval-mode batch_norm with running stats.
    ref = (x - running_mean) * lax.rsqrt(running_var + _EPS) * weight + bias
    assert out.shape == (2, 5)
    assert out.dtype == x.dtype
    assert jnp.allclose(out, ref, atol=1e-5, rtol=1e-5)

    # TODO(synk): training=False => running stats are never updated; the
    # momentum argument of aten.batch_norm is intentionally unused.
    print("KERNEL_OK")
</pallas_src>

<mosaic_0001>
module attributes {stable_mosaic.version = 11 : i64} {
  func.func @bn_apply_kernel(%arg0: memref<2x5xf32, #tpu.memory_space<vmem>>, %arg1: memref<2x5xf32, #tpu.memory_space<vmem>>, %arg2: memref<2x5xf32, #tpu.memory_space<vmem>>) attributes {dimension_semantics = [], scalar_prefetch = 0 : i64, scratch_operands = 0 : i64, tpu.core_type = #tpu.core_type<tc>} {
    %c0 = arith.constant 0 : index
    %c0_0 = arith.constant 0 : index
    %0 = vector.load %arg1[%c0, %c0_0] : memref<2x5xf32, #tpu.memory_space<vmem>>, vector<1x5xf32>
    %c1 = arith.constant 1 : index
    %c0_1 = arith.constant 0 : index
    %1 = vector.load %arg1[%c1, %c0_1] : memref<2x5xf32, #tpu.memory_space<vmem>>, vector<1x5xf32>
    %c0_2 = arith.constant 0 : index
    %c0_3 = arith.constant 0 : index
    %2 = vector.load %arg0[%c0_2, %c0_3] : memref<2x5xf32, #tpu.memory_space<vmem>>, vector<2x5xf32>
    %3 = vector.broadcast %0 : vector<1x5xf32> to vector<2x5xf32>
    %4 = arith.mulf %2, %3 : vector<2x5xf32>
    %5 = vector.broadcast %1 : vector<1x5xf32> to vector<2x5xf32>
    %6 = arith.addf %4, %5 : vector<2x5xf32>
    %c0_4 = arith.constant 0 : index
    %c0_5 = arith.constant 0 : index
    %7 = vector.load %arg2[%c0_4, %c0_5] : memref<2x5xf32, #tpu.memory_space<vmem>>, vector<2x5xf32>
    tpu.vector_store %arg2[%c0_4, %c0_5], %6 {strides = array<i32>} : memref<2x5xf32, #tpu.memory_space<vmem>>, vector<2x5xf32>,
    return
  }
}

</mosaic_0001>

<bundles_post_ra>
// kernel: tpu_custom_call.1
= control target key start
LH: loop header
LB: loop body
LE: loop exit
PB: predicated region body
PF: predicated region fallthrough
CT: control target
= control target key end

     0   :  { %7 = vsyncpa [#allocation3], 0  ;;  %s153_s0 = inlined_call_operand.hbm [shape: f32[2,5], index: 0, kind: input, shape index: {}]   ;;  %s154_s1 = inlined_call_operand.vmem [shape: f32[2,5], index: 1, kind: input, shape index: {}]   ;;  %s155_s2 = inlined_call_operand.hbm [shape: f32[2,5], index: 2, kind: output, shape index: {}]  }
   0x1   :  { %8 = vsyncpa [#allocation4], 0  ;;  %s106_s9 = smov [#allocation2]   ;;  %s58_s13 = scalar_lea.hbm %s153_s0, 32 }
   0x2   :  { %s15_s10 = sshll.u32 %s106_s9, 4  ;;  %p59_p0 = scmp.ne.s32.totalorder %s153_s0, %s58_s13  ;;  %s16_s10 = int_to_ptr.vmem [resolvable:$true] %s15_s10 }
   0x3   :  { %p62_p1 = scmp.lt.u32.totalorder %s58_s13, %s153_s0 }
   0x5   :  { %p64_p2 = pnand %p62_p1, %p59_p0 }
   0x7   :  { %67 = shalt.err (!%p64_p2)
}
   0x8   :  { %s68_s18 = scalar_lea.vmem %s16_s10, 32  ;;  %p73_p4 = scmp.lt.s32.totalorder %s16_s10, %s16_s10 }
   0x9   :  { %p69_p3 = scmp.ne.s32.totalorder %s16_s10, %s68_s18  ;;  %p74_p5 = scmp.lt.s32.totalorder %s68_s18, %s68_s18 }
   0xb   :  { %p75_p6 = por %p74_p5, %p73_p4 }
   0xd   :  { %p76_p7 = pnand %p75_p6, %p69_p3 }
   0xf   :  { %79 = shalt.err (!%p76_p7)
}
  0x10   :  { %18 = dma.hbm_to_vmem [thread:$0]  %s153_s0, 32, %s16_s10, [#allocation3]  }
  0x11   :  { %102 = dma.done.wait [#allocation3], 32  }
  0x12   :  { %103 = vsyncadd [#allocation3], 4294967264  ;;  %s107_s21 = smov [#allocation5]   ;;  %v54_v0 = vld [vmem:[%s154_s1] ss:$0 sm:$0xff]  ;;  %vm37_vm0 = vcmask 33792  }
  0x13   :  { %s45_s22 = sshll.u32 %s107_s21, 4  ;;  %v55_v1 = vld [vmem:[%s154_s1 + $0x1] ss:$0 sm:$0xff]  ;;  %s46_s22 = int_to_ptr.vmem [resolvable:$true] %s45_s22 }
  0x14   :  { %v26_v2 = vld [vmem:[#allocation2] sm:$0x3]  ;;  %s80_s27 = scalar_lea.vmem %s46_s22, 32  ;;  %p85_p9 = scmp.lt.s32.totalorder %s46_s22, %s46_s22 }
  0x15   :  { %v31_v3 = vmul.f32 %v54_v0, %v26_v2  ;;  %p81_p8 = scmp.ne.s32.totalorder %s46_s22, %s80_s27  ;;  %p86_p10 = scmp.lt.s32.totalorder %s80_s27, %s80_s27 }
  0x17   :  { %v36_v4 = vadd.f32 %v55_v1, %v31_v3  ;;  %p87_p11 = por %p86_p10, %p85_p9 }
  0x19   :  { %38 = vst.msk [vmem:[#allocation5] sm:$0x3] %vm37_vm0, %v36_v4  ;;  %p88_p12 = pnand %p87_p11, %p81_p8 }
  0x1b   :  { %91 = shalt.err (!%p88_p12)
}
  0x1c   :  { %s92_s29 = scalar_lea.hbm %s155_s2, 32 }
  0x1d   :  { %p93_p13 = scmp.ne.s32.totalorder %s155_s2, %s92_s29  ;;  %p96_p0 = scmp.lt.u32.totalorder %s92_s29, %s155_s2 }
  0x1f   :  { %p98_p1 = pnand %p96_p0, %p93_p13 }
  0x21   :  { %101 = shalt.err (!%p98_p1)
}
  0x22   :  { %48 = dma.vmem_to_hbm [thread:$0]  %s46_s22, 32, %s155_s2, [#allocation4]  }
  0x23   :  { %104 = dma.done.wait [#allocation4], 32  }
  0x24   :  { %105 = vsyncadd [#allocation4], 4294967264 }
  0x25   :  { %52 = vsyncpa [#allocation3], 1 }
  0x26   :  { %53 = vsyncpa [#allocation4], 1 }

</bundles_post_ra>
